<compile_context>
chip_gen: v5e
topology: v5e:2x2
jax: 0.10.0
libtpu: 0.0.40
codegen_flags: <defaults>
</compile_context>

<pallas_src>
import math
import jax
import jax.numpy as jnp
from jax import lax
from jax.experimental import pallas as pl
from jax.experimental.pallas import tpu as pltpu


def _round_up(x, m):
    return (x + m - 1) // m * m


def _popart_head_kernel(feat_ref, w_ref, bias_ref, out_ref):
    # feat_ref: (TM, K)   w_ref: (N, K)   bias_ref: (1, N)   out_ref: (TM, N)
    acc = lax.dot_general(
        feat_ref[...], w_ref[...],
        dimension_numbers=(((1,), (1,)), ((), ())),   # contract K of both; no transpose
        preferred_element_type=jnp.float32)
    out_ref[...] = (acc + bias_ref[...].astype(jnp.float32)).astype(out_ref.dtype)


def popart_value_head_forward(feature, weight, bias, *, block_m=512):
    """feature: (M, input_dim), weight: (critic_dim, input_dim), bias: (critic_dim,)."""
    M, K = feature.shape
    N, K2 = weight.shape
    assert K == K2 and bias.shape == (N,)

    # Batch tile: >= 512 rows when M is large (amortizes ~0.35us/step overhead),
    # rounded to a sublane multiple; small M collapses to a single tile.
    tm = max(8, _round_up(min(block_m, M), 8))
    m_pad = _round_up(M, tm)
    if m_pad != M:
        feature = jnp.pad(feature, ((0, m_pad - M), (0, 0)))

    bias2d = bias.reshape(1, N)   # lane-major row for broadcast add

    # VMEM budget: lane-padded (K, N -> 128 lanes) and double-buffered tiles.
    lane = 128
    feat_buf = tm * _round_up(K, lane) * 4
    out_buf = tm * _round_up(N, lane) * 4
    w_buf = _round_up(N, 8) * _round_up(K, lane) * 4
    vmem_limit = min(max(4 * (feat_buf + out_buf + w_buf), 16 * 1024 * 1024),
                     64 * 1024 * 1024)

    out = pl.pallas_call(
        _popart_head_kernel,
        out_shape=jax.ShapeDtypeStruct((m_pad, N), feature.dtype),
        grid_spec=pl.GridSpec(
            grid=(m_pad // tm,),
            in_specs=[
                pl.BlockSpec((tm, K), lambda i: (i, 0)),   # feature: tiled over M
                pl.BlockSpec((N, K), lambda i: (0, 0)),    # weight: VMEM-resident
                pl.BlockSpec((1, N), lambda i: (0, 0)),    # bias: VMEM-resident
            ],
            out_specs=pl.BlockSpec((tm, N), lambda i: (i, 0)),
        ),
        compiler_params=pltpu.CompilerParams(
            dimension_semantics=("parallel",),   # shard M across TCs on v7x
            vmem_limit_bytes=vmem_limit),
    )(feature, weight, bias2d)

    if m_pad != M:
        out = out[:M]
    return out


def init_popart_params(key, input_dim, critic_dim, dtype=jnp.float32):
    """Deterministic init mirroring the PyTorch module's __init__:
    kaiming_uniform_(weight, a=sqrt(5)) -> U(-1/sqrt(fan_in), 1/sqrt(fan_in));
    uniform_(bias, -1/sqrt(input_dim), 1/sqrt(input_dim)).
    """
    kw, kb = jax.random.split(key)
    bound = 1.0 / math.sqrt(input_dim)
    weight = jax.random.uniform(kw, (critic_dim, input_dim), dtype,
                                minval=-bound, maxval=bound)
    bias = jax.random.uniform(kb, (critic_dim,), dtype,
                              minval=-bound, maxval=bound)
    return weight, bias


if __name__ == "__main__":
    key = jax.random.PRNGKey(0)
    k_feat, k_param = jax.random.split(key)

    batch = 16
    input_dim = 32
    critic_dim = 8

    feature = jax.random.normal(k_feat, (batch, input_dim), jnp.float32)
    weight, bias = init_popart_params(k_param, input_dim, critic_dim)

    out = popart_value_head_forward(feature, weight, bias)
    out = jax.block_until_ready(out)

    # Reference check against plain JAX linear (== F.linear).
    ref = feature @ weight.T + bias
    assert out.shape == (batch, critic_dim)
    assert jnp.allclose(out, ref, atol=1e-5, rtol=1e-5), "mismatch vs reference"

    # Also exercise a ragged batch (M % TM != 0 path) for correctness.
    batch2 = 13
    feat2 = jax.random.normal(k_feat, (batch2, input_dim), jnp.float32)
    out2 = jax.block_until_ready(popart_value_head_forward(feat2, weight, bias, block_m=8))
    ref2 = feat2 @ weight.T + bias
    assert out2.shape == (batch2, critic_dim)
    assert jnp.allclose(out2, ref2, atol=1e-5, rtol=1e-5), "ragged-tile mismatch"

    # TODO(synk): update()/normalize()/denormalize() use stateful running-mean/std
    # buffers with an optional data-parallel all-reduce; not part of forward, left out.
    print("KERNEL_OK")
</pallas_src>

<mosaic_0001>
module attributes {stable_mosaic.version = 11 : i64} {
  func.func @_popart_head_kernel(%arg0: i32, %arg1: memref<16x32xf32, #tpu.memory_space<vmem>>, %arg2: memref<8x32xf32, #tpu.memory_space<vmem>>, %arg3: memref<1x8xf32, #tpu.memory_space<vmem>>, %arg4: memref<16x8xf32, #tpu.memory_space<vmem>>) attributes {dimension_semantics = [#tpu.dimension_semantics<parallel>], iteration_bounds = array<i64: 1>, scalar_prefetch = 0 : i64, scratch_operands = 0 : i64, tpu.core_type = #tpu.core_type<tc>, window_params = [{transform_indices = @transform_0, window_bounds = array<i64: 16, 32>}, {pipeline_mode = #tpu.pipeline_mode<synchronous>, transform_indices = @transform_1, window_bounds = array<i64: 8, 32>}, {pipeline_mode = #tpu.pipeline_mode<synchronous>, transform_indices = @transform_2, window_bounds = array<i64: 1, 8>}, {transform_indices = @transform_3, window_bounds = array<i64: 16, 8>}]} {
    %c0 = arith.constant 0 : index
    %c0_0 = arith.constant 0 : index
    %0 = vector.load %arg1[%c0, %c0_0] : memref<16x32xf32, #tpu.memory_space<vmem>>, vector<16x32xf32>
    %c0_1 = arith.constant 0 : index
    %c0_2 = arith.constant 0 : index
    %1 = vector.load %arg2[%c0_1, %c0_2] : memref<8x32xf32, #tpu.memory_space<vmem>>, vector<8x32xf32>
    %cst = arith.constant dense<0.000000e+00> : vector<16x8xf32>
    %2 = tpu.matmul %0, %1, %cst {dimension_numbers = #tpu.dot_dimension_numbers<[1], [1], [0], [0], [0, 0, 1, 0], [], []>} : vector<16x32xf32>, vector<8x32xf32>, vector<16x8xf32> -> vector<16x8xf32>
    %c0_3 = arith.constant 0 : index
    %c0_4 = arith.constant 0 : index
    %3 = vector.load %arg3[%c0_3, %c0_4] : memref<1x8xf32, #tpu.memory_space<vmem>>, vector<1x8xf32>
    %4 = vector.broadcast %3 : vector<1x8xf32> to vector<16x8xf32>
    %5 = arith.addf %2, %4 : vector<16x8xf32>
    %c0_5 = arith.constant 0 : index
    %c0_6 = arith.constant 0 : index
    %6 = vector.load %arg4[%c0_5, %c0_6] : memref<16x8xf32, #tpu.memory_space<vmem>>, vector<16x8xf32>
    tpu.vector_store %arg4[%c0_5, %c0_6], %5 {strides = array<i32>} : memref<16x8xf32, #tpu.memory_space<vmem>>, vector<16x8xf32>,
    return
  }
  func.func @transform_0(%arg0: i32) -> (i32, i32) {
    %c0_i32 = arith.constant 0 : i32
    %c0_i32_0 = arith.constant 0 : i32
    return %arg0, %c0_i32 : i32, i32
  }
  func.func @transform_1(%arg0: i32) -> (i32, i32) {
    %c0_i32 = arith.constant 0 : i32
    %c0_i32_0 = arith.constant 0 : i32
    %c0_i32_1 = arith.constant 0 : i32
    return %c0_i32, %c0_i32_0 : i32, i32
  }
  func.func @transform_2(%arg0: i32) -> (i32, i32) {
    %c0_i32 = arith.constant 0 : i32
    %c0_i32_0 = arith.constant 0 : i32
    %c0_i32_1 = arith.constant 0 : i32
    return %c0_i32, %c0_i32_0 : i32, i32
  }
  func.func @transform_3(%arg0: i32) -> (i32, i32) {
    %c0_i32 = arith.constant 0 : i32
    %c0_i32_0 = arith.constant 0 : i32
    return %arg0, %c0_i32 : i32, i32
  }
}

</mosaic_0001>

<bundles_post_ra>
// kernel: tpu_custom_call.1
= control target key start
LH: loop header
LB: loop body
LE: loop exit
PB: predicated region body
PF: predicated region fallthrough
CT: control target
= control target key end

     0   :  { %8 = vsyncpa [#allocation3], 0  ;;  %s193_s0 = inlined_call_operand.hbm [shape: f32[16,32], index: 0, kind: input, shape index: {}]   ;;  %s194_s1 = inlined_call_operand.hbm [shape: f32[8,32], index: 1, kind: input, shape index: {}]   ;;  %s195_s2 = inlined_call_operand.vmem [shape: f32[1,8], index: 2, kind: input, shape index: {}]   ;;  %s196_s3 = inlined_call_operand.vmem [shape: f32[16,8], index: 3, kind: output, shape index: {}]  }
   0x1   :  { %s14_s14 = sshll.u32 %s193_s0, 4  ;;  %s15_s14 = int_to_ptr.hbm [resolvable:$true] %s14_s14 }
   0x2   :  { %9 = vsyncpa [#allocation5], 0  ;;  %s154_s15 = smov [#allocation2]   ;;  %s28_s19 = sshll.u32 %s194_s1, 4  ;;  %s29_s19 = int_to_ptr.hbm [resolvable:$true] %s28_s19 }
   0x3   :  { %s16_s16 = sshll.u32 %s154_s15, 4  ;;  %s155_s20 = smov 128   ;;  %s17_s16 = int_to_ptr.vmem [resolvable:$true] %s16_s16 }
   0x4   :  { %s156_s21 = smov 8   ;;  %s157_s22 = smov [#allocation4]  }
   0x5   :  { %22 = dma.hbm_to_vmem [thread:$0]  %s15_s14, 256, %s17_s16, [#allocation3], %s155_s20, %s155_s20, %s156_s21  }
   0x6   :  { %s30_s23 = sshll.u32 %s157_s22, 4  ;;  %s31_s23 = int_to_ptr.vmem [resolvable:$true] %s30_s23 }
   0x7   :  { %33 = dma.hbm_to_vmem [thread:$0]  %s29_s19, 128, %s31_s23, [#allocation5]  }
   0x8   :  { %150 = dma.done.wait [#allocation3], 256  }
   0x9   :  { %151 = vsyncadd [#allocation3], 4294967040 }
   0xa   :  { %152 = dma.done.wait [#allocation5], 128  }
   0xb   :  { %153 = vsyncadd [#allocation5], 4294967168  ;;  %vm51_vm0 = vcmask 261120   ;;  %v46_v0 = vld [vmem:[#allocation4] sm:$0xff]  ;;  %v44_v1 = vld [vmem:[#allocation2] sm:$0xff]  ;;  %vm84_vm1 = vcmask 64512  }
   0xc   :  { %93 = vmatpush.xpose.msk.msra.mxu0 %vm51_vm0, %v46_v0  ;;  %96 = vmatpush.xpose.msk.msra.mxu1 %vm51_vm0, %v46_v0  ;;  %v45_v2 = vld [vmem:[#allocation2 + $0x8] sm:$0xff]  ;;  %v101_v3 = vld [vmem:[%s195_s2] ss:$0 sm:$0xff] }
   0xf   :  { %94 = vmatmul.msk.f32.vlgmr.msra.gmra.mxu0 %vm51_vm0, %v44_v1  ;;  %95 = vmatmul.msk.f32.vlgmr.msra.gmra.mxu1 %vm51_vm0, %v45_v2 }
  0x8c   :  { %v78_v4 = vpop.f32.mrf.mxu0  ;;  %v81_v5 = vpop.f32.mrf.mxu1 }
  0x8d   :  { %v79_v6 = vadd.f32 %v101_v3, %v78_v4  ;;  %v82_v7 = vadd.f32 %v101_v3, %v81_v5 }
  0x8f   :  { %85 = vst.msk [vmem:[%s196_s3] sm:$0xff] %vm84_vm1, %v79_v6 }
  0x90   :  { %86 = vst.msk [vmem:[%s196_s3 + $0x8] sm:$0xff] %vm84_vm1, %v82_v7 }
  0x91   :  { %91 = vsyncpa [#allocation3], 1 }
  0x92   :  { %92 = vsyncpa [#allocation5], 1 }

</bundles_post_ra>
